<compile_context>
chip_gen: v7x
topology: tpu7x:2x2x1
jax: 0.10.0
libtpu: 0.0.40
codegen_flags: <defaults>
</compile_context>

<pallas_src>
import functools

import numpy as np
import jax
import jax.numpy as jnp
from jax.experimental import pallas as pl
from jax.experimental.pallas import tpu as pltpu


LANE = 128      # last-dim (lane) alignment
SUBLANE = 8     # second-to-last-dim (sublane) alignment
TM_CAP = 128    # max batch-tile rows per grid step
# NOTE: on v6e/v7x (2x256x256 MXU) a 256 cap / 256-multiple tiles fill the MXU
# better for large real layers; 128 keeps the small-shape path minimal.


def _round_up(x, m):
    return ((x + m - 1) // m) * m


# ---------------------------------------------------------------------------
# Path A — fused, fully-unrolled kernel (small / typical dims).
#   grid = (num_batch_tiles,)  ("parallel" → v7x megacore batch sharding)
#   refs = (x_ref, w_0, ..., w_{L-1}, o_ref); every weight is a full VMEM block
#   and the layer chain is unrolled in-kernel, so there is exactly one grid
#   step of work per batch tile (no per-layer grid overhead).
# ---------------------------------------------------------------------------
def _unrolled_mlp_kernel(*refs, num_layers, compute_dtype):
    x_ref = refs[0]
    w_refs = refs[1:1 + num_layers]
    o_ref = refs[1 + num_layers]

    h = x_ref[...].astype(jnp.float32)
    for w_ref in w_refs:
        # bf16 operands on the MXU, f32 accumulation.
        h = jnp.dot(h.astype(compute_dtype), w_ref[...],
                    preferred_element_type=jnp.float32)
    o_ref[...] = h


def _unrolled_forward(x_pad, w_pads, *, tm, out_pad_dim):
    b_pad, p0 = x_pad.shape
    num_layers = len(w_pads)
    kernel = functools.partial(_unrolled_mlp_kernel,
                               num_layers=num_layers,
                               compute_dtype=x_pad.dtype)

    in_specs = [pl.BlockSpec((tm, p0), lambda m: (m, 0))]
    for w in w_pads:
        # Full weight block, constant index → stays resident across batch tiles.
        in_specs.append(pl.BlockSpec(tuple(w.shape), lambda m: (0, 0)))

    return pl.pallas_call(
        kernel,
        out_shape=jax.ShapeDtypeStruct((b_pad, out_pad_dim), jnp.float32),
        grid=(b_pad // tm,),
        in_specs=in_specs,
        out_specs=pl.BlockSpec((tm, out_pad_dim), lambda m: (m, 0)),
        compiler_params=pltpu.CompilerParams(
            dimension_semantics=("parallel",)),
    )(x_pad, *w_pads)


# ---------------------------------------------------------------------------
# Path B — streaming kernel (large dims: weights streamed layer by layer).
#   grid = (num_batch_tiles, num_layers)  ("parallel", "arbitrary")
#   The output block (constant index over the layer axis) IS the resident
#   activation: layer 0 loads x into it, every layer reads and overwrites it.
# ---------------------------------------------------------------------------
def _streaming_mlp_kernel(x_ref, w_ref, o_ref, *, compute_dtype):
    @pl.when(pl.program_id(1) == 0)
    def _():
        o_ref[...] = x_ref[...].astype(jnp.float32)

    o_ref[...] = jnp.dot(o_ref[...].astype(compute_dtype), w_ref[...],
                         preferred_element_type=jnp.float32)


def _streaming_forward(x_pad, w_stack, *, tm):
    b_pad, d = x_pad.shape
    num_layers = w_stack.shape[0]

    # Raise the scoped VMEM limit only when the (double-buffered) weight block
    # + activations actually need it (large D).  On v7x (64 MiB physical) a
    # need beyond ~48 MiB would additionally call for K/N weight tiling.
    w_bytes = d * d * jnp.dtype(w_stack.dtype).itemsize
    act_bytes = tm * d * 4
    need = 3 * w_bytes + 4 * act_bytes
    cp_kwargs = dict(dimension_semantics=("parallel", "arbitrary"))
    if need > (16 << 20):
        cp_kwargs["vmem_limit_bytes"] = int(need)

    kernel = functools.partial(_streaming_mlp_kernel,
                               compute_dtype=x_pad.dtype)

    return pl.pallas_call(
        kernel,
        out_shape=jax.ShapeDtypeStruct((b_pad, d), jnp.float32),
        grid=(b_pad // tm, num_layers),
        in_specs=[
            pl.BlockSpec((tm, d), lambda m, l: (m, 0)),          # x (read at l==0)
            pl.BlockSpec((None, d, d), lambda m, l: (l, 0, 0)),  # W_l streamed
        ],
        out_specs=pl.BlockSpec((tm, d), lambda m, l: (m, 0)),    # resident act
        compiler_params=pltpu.CompilerParams(**cp_kwargs),
    )(x_pad, w_stack)


# ---------------------------------------------------------------------------
# Jitted wrappers (pad with jnp.pad inside the jit so XLA fuses it).
# ---------------------------------------------------------------------------
def _make_forward_unrolled(d_in, d_out, p_dims, param_dtype):
    p0, p_last = p_dims[0], p_dims[-1]

    @jax.jit
    def forward(x, *w_pads):
        B = x.shape[0]
        b_pad = _round_up(max(B, 1), SUBLANE)
        tm = b_pad if b_pad <= TM_CAP else TM_CAP
        b_pad = _round_up(b_pad, tm)
        x_pad = jnp.pad(x.astype(param_dtype),
                        ((0, b_pad - B), (0, p0 - d_in)))
        out = _unrolled_forward(x_pad, w_pads, tm=tm, out_pad_dim=p_last)
        return out[:B, :d_out]

    return forward


def _make_forward_streaming(d_in, d_out, d_pad, param_dtype):
    @jax.jit
    def forward(x, w_stack):
        B = x.shape[0]
        b_pad = _round_up(max(B, 1), SUBLANE)
        tm = b_pad if b_pad <= TM_CAP else TM_CAP
        b_pad = _round_up(b_pad, tm)
        x_pad = jnp.pad(x.astype(param_dtype),
                        ((0, b_pad - B), (0, d_pad - d_in)))
        out = _streaming_forward(x_pad, w_stack, tm=tm)
        return out[:B, :d_out]

    return forward


# ---------------------------------------------------------------------------
# Parameter init matching Net.init_weights():
#   orthogonal_(weight, gain=0.8); bias.zero_()
# ---------------------------------------------------------------------------
def orthogonal_init(key, out_features, in_features, gain=0.8):
    a = jax.random.normal(key, (out_features, in_features), dtype=jnp.float32)
    transposed = out_features < in_features
    if transposed:
        a = a.T
    q, r = jnp.linalg.qr(a)
    d = jnp.sign(jnp.diagonal(r))
    d = jnp.where(d == 0, 1.0, d)          # robust to zero diagonal entries
    q = q * d[None, :]
    if transposed:
        q = q.T
    return gain * q                         # (out, in), PyTorch convention


class NetPallas:
    """Concrete realization of `Net`: a stack of Linear layers whose whole
    forward pass runs in a single Pallas TPU kernel call."""

    def __init__(self, dims, key, param_dtype=jnp.bfloat16,
                 unroll_weight_budget_bytes=8 << 20, force_streaming=False):
        L = len(dims) - 1
        assert L >= 1
        self.dims = list(dims)
        self.param_dtype = param_dtype

        keys = jax.random.split(key, L)
        self.weights_pt = []   # (out, in) f32, PyTorch convention
        self.biases = []       # zero, per init_weights(); NOT fed to the kernel
        for k, d_in, d_out in zip(keys, dims[:-1], dims[1:]):
            self.weights_pt.append(orthogonal_init(k, d_out, d_in, gain=0.8))
            self.biases.append(jnp.zeros((d_out,), jnp.float32))

        # Per-dim lane padding (exact: padded rows/cols are zero).
        p_dims = [max(_round_up(d, LANE), LANE) for d in dims]
        itemsize = jnp.dtype(param_dtype).itemsize
        stack_bytes = sum(pi * po * itemsize
                          for pi, po in zip(p_dims[:-1], p_dims[1:]))
        use_unrolled = ((not force_streaming)
                        and stack_bytes <= unroll_weight_budget_bytes
                        and L <= 16)

        if use_unrolled:
            # Per-layer padded (K_pad, N_pad) weights — no square max-dim slabs.
            self.w_pads = tuple(
                jnp.pad(jnp.asarray(w_pt).T.astype(param_dtype),
                        ((0, pi - w_pt.shape[1]), (0, po - w_pt.shape[0])))
                for w_pt, pi, po in zip(self.weights_pt,
                                        p_dims[:-1], p_dims[1:]))
            self._forward = _make_forward_unrolled(dims[0], dims[-1],
                                                   p_dims, param_dtype)
            self._args = self.w_pads
        else:
            # Streaming path: weights stacked into one (L, D_pad, D_pad) slab.
            # TODO(synk): per-layer (K_pad, N_pad) stacks would avoid streaming
            # zero slabs when dims are non-uniform.
            d_pad = max(p_dims)
            w_stack = np.zeros((L, d_pad, d_pad), np.float32)
            for i, w_pt in enumerate(self.weights_pt):
                d_out_i, d_in_i = w_pt.shape
                w_stack[i, :d_in_i, :d_out_i] = np.asarray(w_pt.T)
            self.w_stack = jnp.asarray(w_stack).astype(param_dtype)
            self._forward = _make_forward_streaming(dims[0], dims[-1],
                                                    d_pad, param_dtype)
            self._args = (self.w_stack,)

    def __call__(self, x):
        return self._forward(x, *self._args)


def _reference_forward(x, weights_pt, param_dtype):
    """Pure-JAX reference with the same numerics (bf16 operands, f32 acc)."""
    h = x.astype(jnp.float32)
    for w_pt in weights_pt:
        w = jnp.asarray(w_pt).T.astype(param_dtype)   # (in, out)
        h = jnp.dot(h.astype(param_dtype), w,
                    preferred_element_type=jnp.float32)
    return h


if __name__ == "__main__":
    key = jax.random.PRNGKey(0)
    k_p1, k_p2, k_x1, k_x2 = jax.random.split(key, 4)

    # --- Path A: small dims → single-step fused, fully-unrolled kernel ------
    batch, dims = 8, [32, 32, 32]
    net = NetPallas(dims, k_p1)
    x = jax.random.normal(k_x1, (batch, dims[0]), dtype=jnp.float32)
    y = jax.block_until_ready(net(x))
    ref = _reference_forward(x, net.weights_pt, net.param_dtype)
    np.testing.assert_allclose(np.asarray(y), np.asarray(ref),
                               rtol=2e-2, atol=2e-2)
    # Also sanity-check against the full-f32 linear chain (loose: bf16 weights).
    ref_f32 = x
    for w_pt, b in zip(net.weights_pt, net.biases):
        ref_f32 = ref_f32 @ w_pt.T + b
    np.testing.assert_allclose(np.asarray(y), np.asarray(ref_f32),
                               rtol=5e-2, atol=5e-2)

    # --- Path B: force the streaming (weights-per-layer) kernel -------------
    batch2, dims2 = 16, [128, 256, 128]
    net2 = NetPallas(dims2, k_p2, force_streaming=True)
    x2 = jax.random.normal(k_x2, (batch2, dims2[0]), dtype=jnp.float32)
    y2 = jax.block_until_ready(net2(x2))
    ref2 = _reference_forward(x2, net2.weights_pt, net2.param_dtype)
    np.testing.assert_allclose(np.asarray(y2), np.asarray(ref2),
                               rtol=2e-2, atol=2e-2)

    print("KERNEL_OK")
</pallas_src>

<mosaic_0001>
module attributes {stable_mosaic.version = 11 : i64} {
  func.func @_unrolled_mlp_kernel(%arg0: i32, %arg1: memref<8x128xbf16, #tpu.memory_space<vmem>>, %arg2: memref<128x128xbf16, #tpu.memory_space<vmem>>, %arg3: memref<128x128xbf16, #tpu.memory_space<vmem>>, %arg4: memref<8x128xf32, #tpu.memory_space<vmem>>) attributes {dimension_semantics = [#tpu.dimension_semantics<parallel>], iteration_bounds = array<i64: 1>, scalar_prefetch = 0 : i64, scratch_operands = 0 : i64, tpu.core_type = #tpu.core_type<tc>, window_params = [{transform_indices = @transform_0, window_bounds = array<i64: 8, 128>}, {pipeline_mode = #tpu.pipeline_mode<synchronous>, transform_indices = @transform_1, window_bounds = array<i64: 128, 128>}, {pipeline_mode = #tpu.pipeline_mode<synchronous>, transform_indices = @transform_2, window_bounds = array<i64: 128, 128>}, {transform_indices = @transform_3, window_bounds = array<i64: 8, 128>}]} {
    %c0 = arith.constant 0 : index
    %c0_0 = arith.constant 0 : index
    %0 = vector.load %arg1[%c0, %c0_0] : memref<8x128xbf16, #tpu.memory_space<vmem>>, vector<8x128xbf16>
    %1 = arith.extf %0 : vector<8x128xbf16> to vector<8x128xf32>
    %2 = arith.truncf %1 : vector<8x128xf32> to vector<8x128xbf16>
    %c0_1 = arith.constant 0 : index
    %c0_2 = arith.constant 0 : index
    %3 = vector.load %arg2[%c0_1, %c0_2] : memref<128x128xbf16, #tpu.memory_space<vmem>>, vector<128x128xbf16>
    %cst = arith.constant dense<0.000000e+00> : vector<8x128xf32>
    %4 = tpu.matmul %2, %3, %cst {dimension_numbers = #tpu.dot_dimension_numbers<[1], [0], [0], [1], [0, 0, 1, 1], [], []>} : vector<8x128xbf16>, vector<128x128xbf16>, vector<8x128xf32> -> vector<8x128xf32>
    %5 = arith.truncf %4 : vector<8x128xf32> to vector<8x128xbf16>
    %c0_3 = arith.constant 0 : index
    %c0_4 = arith.constant 0 : index
    %6 = vector.load %arg3[%c0_3, %c0_4] : memref<128x128xbf16, #tpu.memory_space<vmem>>, vector<128x128xbf16>
    %cst_5 = arith.constant dense<0.000000e+00> : vector<8x128xf32>
    %7 = tpu.matmul %5, %6, %cst_5 {dimension_numbers = #tpu.dot_dimension_numbers<[1], [0], [0], [1], [0, 0, 1, 1], [], []>} : vector<8x128xbf16>, vector<128x128xbf16>, vector<8x128xf32> -> vector<8x128xf32>
    %c0_6 = arith.constant 0 : index
    %c0_7 = arith.constant 0 : index
    %8 = vector.load %arg4[%c0_6, %c0_7] : memref<8x128xf32, #tpu.memory_space<vmem>>, vector<8x128xf32>
    tpu.vector_store %arg4[%c0_6, %c0_7], %7 {strides = array<i32>} : memref<8x128xf32, #tpu.memory_space<vmem>>, vector<8x128xf32>,
    return
  }
  func.func @transform_0(%arg0: i32) -> (i32, i32) {
    %c0_i32 = arith.constant 0 : i32
    %c0_i32_0 = arith.constant 0 : i32
    return %arg0, %c0_i32 : i32, i32
  }
  func.func @transform_1(%arg0: i32) -> (i32, i32) {
    %c0_i32 = arith.constant 0 : i32
    %c0_i32_0 = arith.constant 0 : i32
    %c0_i32_1 = arith.constant 0 : i32
    return %c0_i32, %c0_i32_0 : i32, i32
  }
  func.func @transform_2(%arg0: i32) -> (i32, i32) {
    %c0_i32 = arith.constant 0 : i32
    %c0_i32_0 = arith.constant 0 : i32
    %c0_i32_1 = arith.constant 0 : i32
    return %c0_i32, %c0_i32_0 : i32, i32
  }
  func.func @transform_3(%arg0: i32) -> (i32, i32) {
    %c0_i32 = arith.constant 0 : i32
    %c0_i32_0 = arith.constant 0 : i32
    return %arg0, %c0_i32 : i32, i32
  }
}

</mosaic_0001>

<bundles_post_ra>
// kernel: forward.1
= control target key start
LH: loop header
LB: loop body
LE: loop exit
PB: predicated region body
PF: predicated region fallthrough
CT: control target
= control target key end

     0   :  { %8 = vsyncpa [#allocation3], 0  ;;  %s506_s0 = inlined_call_operand.vmem [shape: bf16[8,128], index: 0, kind: input, shape index: {}]   ;;  %s507_s1 = inlined_call_operand.hbm [shape: bf16[128,128], index: 1, kind: input, shape index: {}]   ;;  %s508_s2 = inlined_call_operand.hbm [shape: bf16[128,128], index: 2, kind: input, shape index: {}]   ;;  %s509_s3 = inlined_call_operand.hbm [shape: f32[8,128], index: 3, kind: output, shape index: {}]  }
   0x1   :  { %9 = vsyncpa [#allocation6], 0 }
   0x2   :  { %10 = vsyncpa [#allocation4], 0  ;;  %s440_s12 = smov [#allocation2]   ;;  %s368_s16 = scalar_lea.hbm %s507_s1, 1024 }
   0x3   :  { %s18_s13 = sshll.u32 %s440_s12, 4  ;;  %p369_p0 = scmp.ne.s32.totalorder %s507_s1, %s368_s16  ;;  %s19_s13 = int_to_ptr.vmem [resolvable:$true] %s18_s13 }
   0x4   :  { %p372_p1 = scmp.lt.u32.totalorder %s368_s16, %s507_s1 }
   0x6   :  { %p374_p2 = pnand %p372_p1, %p369_p0 }
   0x8   :  { %377 = shalt.err (!%p374_p2)
}
   0x9   :  { %s378_s21 = scalar_lea.vmem %s19_s13, 1024  ;;  %p383_p4 = scmp.lt.s32.totalorder %s19_s13, %s19_s13 }
   0xa   :  { %p379_p3 = scmp.ne.s32.totalorder %s19_s13, %s378_s21  ;;  %p384_p5 = scmp.lt.s32.totalorder %s378_s21, %s378_s21 }
   0xc   :  { %p385_p6 = por %p384_p5, %p383_p4 }
   0xe   :  { %p386_p7 = pnand %p385_p6, %p379_p3 }
  0x10   :  { %389 = shalt.err (!%p386_p7)
}
  0x11   :  { %s441_s22 = smov 64   ;;  %s442_s23 = smov 4  }
  0x12   :  { %24 = dma.hbm_to_vmem [thread:$0]  %s507_s1, 1024, %s19_s13, [#allocation3], %s441_s22, %s441_s22, %s442_s23  }
  0x13   :  { %s443_s26 = smov [#allocation5]   ;;  %s390_s30 = scalar_lea.hbm %s508_s2, 1024 }
  0x14   :  { %s30_s27 = sshll.u32 %s443_s26, 4  ;;  %p391_p8 = scmp.ne.s32.totalorder %s508_s2, %s390_s30  ;;  %s31_s27 = int_to_ptr.vmem [resolvable:$true] %s30_s27 }
  0x15   :  { %p394_p9 = scmp.lt.u32.totalorder %s390_s30, %s508_s2 }
  0x17   :  { %p396_p10 = pnand %p394_p9, %p391_p8 }
  0x19   :  { %399 = shalt.err (!%p396_p10)
}
  0x1a   :  { %s400_s8 = scalar_lea.vmem %s31_s27, 1024  ;;  %p405_p12 = scmp.lt.s32.totalorder %s31_s27, %s31_s27 }
  0x1b   :  { %p401_p11 = scmp.ne.s32.totalorder %s31_s27, %s400_s8  ;;  %p406_p13 = scmp.lt.s32.totalorder %s400_s8, %s400_s8 }
  0x1d   :  { %p407_p0 = por %p406_p13, %p405_p12 }
  0x1f   :  { %p408_p1 = pnand %p407_p0, %p401_p11 }
  0x21   :  { %411 = shalt.err (!%p408_p1)
}
  0x22   :  { %36 = dma.hbm_to_vmem [thread:$0]  %s508_s2, 1024, %s31_s27, [#allocation6], %s441_s22, %s441_s22, %s442_s23  }
  0x23   :  { %434 = dma.done.wait [#allocation3], 1024  }
  0x24   :  { %435 = vsyncadd [#allocation3], 4294966272 }
  0x25   :  { %436 = dma.done.wait [#allocation6], 1024  }
  0x26   :  { %437 = vsyncadd [#allocation6], 4294966272  ;;  %v444_v0 = vmov 0.0   ;;  %vm445_vm0 = vmmov 0   ;;  %v352_v1 = vld [vmem:[#allocation2] sm:$0xff]   ;;  %v353_v2 = vld [vmem:[#allocation2 + $0x8] sm:$0xff]  }
  0x27   :  { %305 = vmatprep.subr.bf16.mxu0 %v444_v0  ;;  %321 = vmatprep.mubr.msk.bf16.mxu0 %vm445_vm0, %v444_v0  ;;  %v354_v3 = vld [vmem:[#allocation2 + $0x10] sm:$0xff]   ;;  %v360_v4 = vld [vmem:[#allocation5] sm:$0xff]   ;;  %v355_v5 = vld [vmem:[#allocation2 + $0x18] sm:$0xff]   ;;  %s446_s11 = smov [#allocation7]  }
  0x28   :  { %325 = vmatprep.subr.bf16.mxu1 %v444_v0  ;;  %341 = vmatprep.mubr.msk.bf16.mxu1 %vm445_vm0, %v444_v0  ;;  %v361_v6 = vld [vmem:[#allocation5 + $0x8] sm:$0xff]   ;;  %v356_v7 = vld [vmem:[#allocation2 + $0x20] sm:$0xff]   ;;  %v362_v8 = vld [vmem:[#allocation5 + $0x10] sm:$0xff]   ;;  %s261_s12 = sshll.u32 %s446_s11, 4  ;;  %s262_s12 = int_to_ptr.vmem [resolvable:$true] %s261_s12 }
  0x29   :  { %306 = vmatpush3.bf16.msra.mxu0 %v352_v1  ;;  %326 = vmatpush3.bf16.msra.mxu1 %v360_v4  ;;  %v357_v9 = vld [vmem:[#allocation2 + $0x28] sm:$0xff]   ;;  %v363_v10 = vld [vmem:[#allocation5 + $0x18] sm:$0xff]   ;;  %v358_v11 = vld [vmem:[#allocation2 + $0x30] sm:$0xff]   ;;  %p417_p3 = scmp.lt.s32.totalorder %s262_s12, %s262_s12 }
  0x2a   :  { %307 = vmatprep.subr.bf16.mxu0 %v444_v0  ;;  %327 = vmatprep.subr.bf16.mxu1 %v444_v0  ;;  %v364_v12 = vld [vmem:[#allocation5 + $0x20] sm:$0xff]   ;;  %v359_v13 = vld [vmem:[#allocation2 + $0x38] sm:$0xff]   ;;  %v365_v14 = vld [vmem:[#allocation5 + $0x28] sm:$0xff]  }
  0x2b   :  { %v44_v15 = vld [vmem:[%s506_s0] sm:$0xf]  ;;  %v366_v16 = vld [vmem:[#allocation5 + $0x30] sm:$0xff]   ;;  %v367_v17 = vld [vmem:[#allocation5 + $0x38] sm:$0xff]   ;;  %s412_s0 = scalar_lea.vmem %s262_s12, 128 }
  0x2c   :  { %p413_p2 = scmp.ne.s32.totalorder %s262_s12, %s412_s0  ;;  %p418_p4 = scmp.lt.s32.totalorder %s412_s0, %s412_s0 }
  0x2d   :  { %308 = vmatpush3.bf16.msra.mxu0 %v353_v2  ;;  %328 = vmatpush3.bf16.msra.mxu1 %v361_v6 }
  0x2e   :  { %309 = vmatprep.subr.bf16.mxu0 %v444_v0  ;;  %329 = vmatprep.subr.bf16.mxu1 %v444_v0  ;;  %p419_p5 = por %p418_p4, %p417_p3 }
  0x30   :  { %p420_p6 = pnand %p419_p5, %p413_p2 }
  0x31   :  { %310 = vmatpush3.bf16.msra.mxu0 %v354_v3  ;;  %330 = vmatpush3.bf16.msra.mxu1 %v362_v8 }
  0x32   :  { %311 = vmatprep.subr.bf16.mxu0 %v444_v0  ;;  %331 = vmatprep.subr.bf16.mxu1 %v444_v0 }
  0x35   :  { %312 = vmatpush3.bf16.msra.mxu0 %v355_v5  ;;  %332 = vmatpush3.bf16.msra.mxu1 %v363_v10 }
  0x36   :  { %313 = vmatprep.subr.bf16.mxu0 %v444_v0  ;;  %333 = vmatprep.subr.bf16.mxu1 %v444_v0 }
  0x39   :  { %314 = vmatpush3.bf16.msra.mxu0 %v356_v7  ;;  %334 = vmatpush3.bf16.msra.mxu1 %v364_v12 }
  0x3a   :  { %315 = vmatprep.subr.bf16.mxu0 %v444_v0  ;;  %335 = vmatprep.subr.bf16.mxu1 %v444_v0 }
  0x3d   :  { %316 = vmatpush3.bf16.msra.mxu0 %v357_v9  ;;  %336 = vmatpush3.bf16.msra.mxu1 %v365_v14 }
  0x3e   :  { %317 = vmatprep.subr.bf16.mxu0 %v444_v0  ;;  %337 = vmatprep.subr.bf16.mxu1 %v444_v0 }
  0x41   :  { %318 = vmatpush3.bf16.msra.mxu0 %v358_v11  ;;  %338 = vmatpush3.bf16.msra.mxu1 %v366_v16 }
  0x42   :  { %319 = vmatprep.subr.bf16.mxu0 %v444_v0  ;;  %339 = vmatprep.subr.bf16.mxu1 %v444_v0 }
  0x45   :  { %320 = vmatpush3.bf16.msra.mxu0 %v359_v13  ;;  %340 = vmatpush3.bf16.msra.mxu1 %v367_v17 }
  0x48   :  { %322 = vmatmul.mubr.bf16.vlgmr.msra.gmra.mrb[0].mxu0 %v44_v15 }
 0x11b   :  { %v143_v18 = vpop.f32.mrb[0].mxu0 }
 0x11c   :  { %v149_v19 = vpack.c.bf16 %v143_v18, %v143_v18  ;;  %v323_v20 = vpop.f32.mrb[1].mxu0 }
 0x11d   :  { %v146_v21 = vpop.f32.mrb[2].mxu0 }
 0x11e   :  { %v324_v22 = vpop.f32.mrb[3].mxu0  ;;  %342 = vmatmul.mubr.bf16.vlgmr.msra.gmra.mrb[0].mxu1 %v149_v19 }
 0x1f1   :  { %v248_v23 = vpop.f32.mrb[0].mxu1 }
 0x1f2   :  { %254 = vst [vmem:[#allocation7] sm:$0xff] %v248_v23  ;;  %v343_v24 = vpop.f32.mrb[1].mxu1 }
 0x1f3   :  { %v251_v25 = vpop.f32.mrb[2].mxu1 }
 0x1f4   :  { %423 = shalt.err (!%p420_p6)
}
 0x1f5   :  { %s424_s15 = scalar_lea.hbm %s509_s3, 128 }
 0x1f6   :  { %p425_p7 = scmp.ne.s32.totalorder %s509_s3, %s424_s15  ;;  %p428_p8 = scmp.lt.u32.totalorder %s424_s15, %s509_s3 }
 0x1f8   :  { %p430_p9 = pnand %p428_p8, %p425_p7 }
 0x1fa   :  { %433 = shalt.err (!%p430_p9)
}
 0x1fb   :  { %264 = dma.vmem_to_hbm [thread:$0]  %s262_s12, 128, %s509_s3, [#allocation4]   ;;  %v344_v26 = vpop.f32.mrb[3].mxu1 }
 0x1fc   :  { %438 = dma.done.wait [#allocation4], 128  }
 0x1fd   :  { %439 = vsyncadd [#allocation4], 4294967168 }
 0x1fe   :  { %268 = vsyncpa [#allocation3], 1 }
 0x1ff   :  { %269 = vsyncpa [#allocation6], 1 }
 0x200   :  { %270 = vsyncpa [#allocation4], 1 }

</bundles_post_ra>
